<compile_context>
chip_gen: v5e
topology: v5e:2x2
jax: 0.10.0
libtpu: 0.0.40
codegen_flags: <defaults>
</compile_context>

<pallas_src>
import functools

import jax
import jax.numpy as jnp
from jax.experimental import pallas as pl
from jax.experimental.pallas import tpu as pltpu


# ---------------------------------------------------------------------------
# Fused Pallas kernel: all layers + pooled readout, everything VMEM-resident.
# ---------------------------------------------------------------------------
def _hlcn_fused_kernel(*refs, num_layers):
    """refs = (x_ref, w_ref_0, ..., w_ref_{L-1}, readout_ref, out_ref).

    x_ref       : (B, C*D)                 flat input (contiguous reshape of (B,C,D))
    w_ref_l     : (in_dim_l, NP_l*nn_dim)  block-diag weights, scale folded in
    readout_ref : (NP_last*nn_dim, O_out)  readout tiled over patches, mean & 1/norm folded in
    out_ref     : (B, O_out)
    """
    x_ref = refs[0]
    w_refs = refs[1:1 + num_layers]
    r_ref = refs[1 + num_layers]
    o_ref = refs[2 + num_layers]

    h = x_ref[...]                                         # (B, C*D)
    for li in range(num_layers):
        # One MXU matmul per layer; ReLU on the VPU. No reshapes between layers.
        h = jnp.maximum(
            jnp.dot(h, w_refs[li][...], preferred_element_type=jnp.float32),
            0.0)
    # Fused epilogue: mean-over-patches + readout + /norm == one matmul.
    out = jnp.dot(h, r_ref[...], preferred_element_type=jnp.float32)
    o_ref[...] = out.astype(o_ref.dtype)


# ---------------------------------------------------------------------------
# One-time host-side parameter re-layout (hoisted out of the per-call hot path)
# ---------------------------------------------------------------------------
def prepare_params(filters, readout_w, *, patch_size, norm):
    """Build block-diagonal per-layer weights and the mean/norm-folded readout.

    filters[l] : (out_ch, in_ch, NP_l, K)  (PyTorch MyLoc1d layout)
    readout_w  : (nn_dim, out_channels)

    Layer 0 input column order is (c, p, k)        -> rows ordered  c*(NP*K) + p*K + k
    Layer l>=1 input column order is (p_in, c)     -> rows ordered  (p*K + k)*Cin + c
    which matches the previous layer's flat output (patch-major, channel-minor).
    """
    K = patch_size
    w_bd = []
    prev_np = None
    for li, f in enumerate(filters):
        O, Cin, NP, Kf = f.shape
        assert Kf == K, "kernel assumes filter_size == patch_size"
        if li > 0:
            assert prev_np == NP * K, "stride == patch_size (non-overlapping) assumed"
        scale = float((Cin * Kf) ** -0.5)
        eye = jnp.eye(NP, dtype=f.dtype)
        if li == 0:
            wt = jnp.transpose(f, (1, 2, 3, 0)) * scale               # (C, NP, K, O)
            W = wt[:, :, :, None, :] * eye[None, :, None, :, None]    # (C, NP, K, NP, O)
            w_bd.append(W.reshape(Cin * NP * K, NP * O))
        else:
            wt = jnp.transpose(f, (2, 3, 1, 0)) * scale               # (NP, K, Cin, O)
            W = wt[:, :, :, None, :] * eye[:, None, None, :, None]    # (NP, K, Cin, NP, O)
            w_bd.append(W.reshape(NP * K * Cin, NP * O))
        prev_np = NP

    NP_last = filters[-1].shape[2]
    # mean over patches (1/NP_last) and 1/norm folded into the tiled readout.
    readout_exp = jnp.tile(readout_w, (NP_last, 1)) * float(1.0 / (NP_last * norm))
    return w_bd, readout_exp


# ---------------------------------------------------------------------------
# Forward wrapper
# ---------------------------------------------------------------------------
@jax.jit
def hlcn_forward(x, w_bd, readout_exp):
    """x: (B, in_channels, input_dim) -> (B, out_channels)."""
    B = x.shape[0]
    num_layers = len(w_bd)
    O_out = readout_exp.shape[1]

    # Contiguous flatten only -- no transpose, no extra HBM round trip.
    x_flat = x.reshape(B, -1)
    assert x_flat.shape[1] == w_bd[0].shape[0]

    flops = 0
    for w in list(w_bd) + [readout_exp]:
        flops += 2 * B * int(w.shape[0]) * int(w.shape[1])
    bytes_accessed = 4 * int(x_flat.size + sum(w.size for w in w_bd)
                             + readout_exp.size + B * O_out)

    kernel = functools.partial(_hlcn_fused_kernel, num_layers=num_layers)

    # No grid: all operands are tiny and mapped whole into VMEM; one DMA in per
    # tensor, all inter-layer activations stay VMEM-resident.
    return pl.pallas_call(
        kernel,
        out_shape=jax.ShapeDtypeStruct((B, O_out), jnp.float32),
        in_specs=[pl.BlockSpec(memory_space=pltpu.MemorySpace.VMEM)]
                 * (num_layers + 2),
        out_specs=pl.BlockSpec(memory_space=pltpu.MemorySpace.VMEM),
        cost_estimate=pl.CostEstimate(
            flops=flops, transcendentals=0, bytes_accessed=bytes_accessed),
    )(x_flat, *w_bd, readout_exp)


# ---------------------------------------------------------------------------
# Pure-JAX reference (mirrors the PyTorch module semantics)
# ---------------------------------------------------------------------------
def myloc1d_ref(x, w, stride):
    O, C, NP, K = w.shape
    xp = jnp.stack([x[:, :, p * stride:p * stride + K] for p in range(NP)],
                   axis=2)                                   # (B, C, NP, K)
    out = jnp.einsum('bcpk,ocpk->bop', xp, w,
                     precision=jax.lax.Precision.HIGHEST)
    return out * (C * K) ** (-0.5)


def hlcn_ref(x, filters, readout_w, patch_size, norm):
    h = x
    for w in filters:
        h = jax.nn.relu(myloc1d_ref(h, w, stride=patch_size))
    pooled = h.mean(axis=-1)                                 # (B, nn_dim)
    return jnp.dot(pooled, readout_w,
                   precision=jax.lax.Precision.HIGHEST) / norm


# ---------------------------------------------------------------------------
# Main
# ---------------------------------------------------------------------------
if __name__ == "__main__":
    # Model hyper-parameters (small, consistent with the module's forward).
    batch = 2
    in_channels = 4
    input_dim = 16
    patch_size = 2
    nn_dim = 32
    out_channels = 8
    num_layers = 2            # receptive_field = 4, divides input_dim = 16
    norm = nn_dim ** 0.5      # norm == 'std'

    assert input_dim % (patch_size ** num_layers) == 0

    key = jax.random.PRNGKey(0)
    k_x, k_r, *k_w = jax.random.split(key, 2 + num_layers)

    # Deterministic standard-normal parameter init (torch.randn equivalent).
    filters = []
    dim = input_dim
    c_in = in_channels
    for l in range(num_layers):
        np_l = (dim - patch_size) // patch_size + 1
        filters.append(jax.random.normal(
            k_w[l], (nn_dim, c_in, np_l, patch_size), dtype=jnp.float32))
        dim //= patch_size
        c_in = nn_dim
    readout_w = jax.random.normal(k_r, (nn_dim, out_channels), dtype=jnp.float32)
    x = jax.random.normal(k_x, (batch, in_channels, input_dim), dtype=jnp.float32)

    # One-time weight re-layout (outside the forward hot path).
    w_bd, readout_exp = prepare_params(
        filters, readout_w, patch_size=patch_size, norm=norm)
    w_bd = jax.block_until_ready(w_bd)
    readout_exp = jax.block_until_ready(readout_exp)

    out = hlcn_forward(x, w_bd, readout_exp)
    out = jax.block_until_ready(out)

    ref = hlcn_ref(x, filters, readout_w, patch_size, norm)
    assert out.shape == (batch, out_channels)
    assert jnp.allclose(out, ref, atol=1e-3, rtol=1e-3), (out, ref)

    print("KERNEL_OK")
</pallas_src>

<mosaic_0001>
module attributes {stable_mosaic.version = 11 : i64} {
  func.func @_hlcn_fused_kernel(%arg0: memref<2x64xf32, #tpu.memory_space<vmem>>, %arg1: memref<64x256xf32, #tpu.memory_space<vmem>>, %arg2: memref<256x128xf32, #tpu.memory_space<vmem>>, %arg3: memref<128x8xf32, #tpu.memory_space<vmem>>, %arg4: memref<2x8xf32, #tpu.memory_space<vmem>>) attributes {dimension_semantics = [], scalar_prefetch = 0 : i64, scratch_operands = 0 : i64, tpu.core_type = #tpu.core_type<tc>} {
    %c0 = arith.constant 0 : index
    %c0_0 = arith.constant 0 : index
    %0 = vector.load %arg0[%c0, %c0_0] : memref<2x64xf32, #tpu.memory_space<vmem>>, vector<2x64xf32>
    %c0_1 = arith.constant 0 : index
    %c0_2 = arith.constant 0 : index
    %1 = vector.load %arg1[%c0_1, %c0_2] : memref<64x256xf32, #tpu.memory_space<vmem>>, vector<64x256xf32>
    %cst = arith.constant dense<0.000000e+00> : vector<2x256xf32>
    %2 = tpu.matmul %0, %1, %cst {dimension_numbers = #tpu.dot_dimension_numbers<[1], [0], [0], [1], [0, 0, 1, 1], [], []>} : vector<2x64xf32>, vector<64x256xf32>, vector<2x256xf32> -> vector<2x256xf32>
    %cst_3 = arith.constant 0.000000e+00 : f32
    %3 = vector.broadcast %cst_3 : f32 to vector<2x256xf32>
    %4 = arith.maximumf %2, %3 : vector<2x256xf32>
    %c0_4 = arith.constant 0 : index
    %c0_5 = arith.constant 0 : index
    %5 = vector.load %arg2[%c0_4, %c0_5] : memref<256x128xf32, #tpu.memory_space<vmem>>, vector<256x128xf32>
    %cst_6 = arith.constant dense<0.000000e+00> : vector<2x128xf32>
    %6 = tpu.matmul %4, %5, %cst_6 {dimension_numbers = #tpu.dot_dimension_numbers<[1], [0], [0], [1], [0, 0, 1, 1], [], []>} : vector<2x256xf32>, vector<256x128xf32>, vector<2x128xf32> -> vector<2x128xf32>
    %cst_7 = arith.constant 0.000000e+00 : f32
    %7 = vector.broadcast %cst_7 : f32 to vector<2x128xf32>
    %8 = arith.maximumf %6, %7 : vector<2x128xf32>
    %c0_8 = arith.constant 0 : index
    %c0_9 = arith.constant 0 : index
    %9 = vector.load %arg3[%c0_8, %c0_9] : memref<128x8xf32, #tpu.memory_space<vmem>>, vector<128x8xf32>
    %cst_10 = arith.constant dense<0.000000e+00> : vector<2x8xf32>
    %10 = tpu.matmul %8, %9, %cst_10 {dimension_numbers = #tpu.dot_dimension_numbers<[1], [0], [0], [1], [0, 0, 1, 1], [], []>} : vector<2x128xf32>, vector<128x8xf32>, vector<2x8xf32> -> vector<2x8xf32>
    %c0_11 = arith.constant 0 : index
    %c0_12 = arith.constant 0 : index
    %11 = vector.load %arg4[%c0_11, %c0_12] : memref<2x8xf32, #tpu.memory_space<vmem>>, vector<2x8xf32>
    tpu.vector_store %arg4[%c0_11, %c0_12], %10 {strides = array<i32>} : memref<2x8xf32, #tpu.memory_space<vmem>>, vector<2x8xf32>,
    return
  }
}

</mosaic_0001>

<bundles_post_ra>
// kernel: hlcn_forward.1
= control target key start
LH: loop header
LB: loop body
LE: loop exit
PB: predicated region body
PF: predicated region fallthrough
CT: control target
= control target key end

     0   :  { %9 = vsyncpa [#allocation3], 0  ;;  %s419_s0 = inlined_call_operand.vmem [shape: f32[2,64], index: 0, kind: input, shape index: {}]   ;;  %s420_s1 = inlined_call_operand.vmem [shape: f32[64,256], index: 1, kind: input, shape index: {}]   ;;  %s421_s2 = inlined_call_operand.hbm [shape: f32[256,128], index: 2, kind: input, shape index: {}]   ;;  %s422_s3 = inlined_call_operand.vmem [shape: f32[128,8], index: 3, kind: input, shape index: {}]   ;;  %s423_s4 = inlined_call_operand.hbm [shape: f32[2,8], index: 4, kind: output, shape index: {}]  }
   0x1   :  { %10 = vsyncpa [#allocation4], 0  ;;  %s19_s17 = sshll.u32 %s421_s2, 4  ;;  %s283_s18 = smov [#allocation2]   ;;  %s20_s17 = int_to_ptr.hbm [resolvable:$true] %s19_s17 }
   0x2   :  { %s21_s19 = sshll.u32 %s283_s18, 4  ;;  %s284_s20 = smov 128   ;;  %s22_s19 = int_to_ptr.vmem [resolvable:$true] %s21_s19 }
   0x3   :  { %s285_s21 = smov 8  }
   0x4   :  { %27 = dma.hbm_to_vmem [thread:$0]  %s20_s17, 4096, %s22_s19, [#allocation3], %s284_s20, %s284_s20, %s285_s21  }
   0x5   :  { %279 = dma.done.wait [#allocation3], 4096  }
   0x6   :  { %280 = vsyncadd [#allocation3], 4294963200  ;;  %v49_v0 = vld [vmem:[%s420_s1 + $0x70] sm:$0xff]  ;;  %v47_v1 = vld [vmem:[%s420_s1 + $0x60] sm:$0xff]  ;;  %vm51_vm0 = vcmask 523264   ;;  %s286_s29 = smov [#allocation5]  }
   0x7   :  { %63 = vmatpush.msra.mxu1 %v49_v0  ;;  %v45_v2 = vld [vmem:[%s420_s1 + $0x50] sm:$0xff]  ;;  %v43_v3 = vld [vmem:[%s420_s1 + $0x40] sm:$0xff]  ;;  %v112_v4 = vld [vmem:[#allocation2 + $0x78] sm:$0xff]  ;;  %s213_s30 = sshll.u32 %s286_s29, 4  ;;  %s215_s7 = sshll.u32 %s423_s4, 4  ;;  %vm206_vm1 = vcmask 58368   ;;  %s214_s30 = int_to_ptr.vmem [resolvable:$true] %s213_s30  ;;  %s216_s7 = int_to_ptr.hbm [resolvable:$true] %s215_s7 }
   0x8   :  { %v41_v5 = vld [vmem:[%s420_s1 + $0x30] sm:$0xff]  ;;  %129 = vmatpush.msra.mxu2 %v112_v4  ;;  %v110_v7 = vld [vmem:[#allocation2 + $0x68] sm:$0xff]  ;;  %v128_v8 = vld [vmem:[#allocation2 + $0xf8] sm:$0xff] }
   0x9   :  { %64 = vmatpush.msra.mxu1 %v47_v1  ;;  %v111_v6 = vld [vmem:[#allocation2 + $0x70] sm:$0xff]  ;;  %v39_v9 = vld [vmem:[%s420_s1 + $0x20] sm:$0xff]  ;;  %149 = vmatpush.msra.mxu3 %v128_v8  ;;  %v126_v12 = vld [vmem:[#allocation2 + $0xe8] sm:$0xff] }
   0xa   :  { %130 = vmatpush.msra.mxu2 %v111_v6  ;;  %v127_v10 = vld [vmem:[#allocation2 + $0xf0] sm:$0xff]  ;;  %v109_v11 = vld [vmem:[#allocation2 + $0x60] sm:$0xff]  ;;  %v108_v14 = vld [vmem:[#allocation2 + $0x58] sm:$0xff] }
   0xb   :  { %65 = vmatpush.msra.mxu1 %v45_v2  ;;  %v37_v13 = vld [vmem:[%s420_s1 + $0x10] sm:$0xff]  ;;  %150 = vmatpush.msra.mxu3 %v127_v10  ;;  %v125_v15 = vld [vmem:[#allocation2 + $0xe0] sm:$0xff]  ;;  %v50_v17 = vld [vmem:[%s420_s1 + $0x78] sm:$0xff] }
   0xc   :  { %131 = vmatpush.msra.mxu2 %v110_v7  ;;  %v35_v16 = vld [vmem:[%s420_s1] sm:$0xff]  ;;  %v107_v18 = vld [vmem:[#allocation2 + $0x50] sm:$0xff]  ;;  %v124_v20 = vld [vmem:[#allocation2 + $0xd8] sm:$0xff] }
   0xd   :  { %66 = vmatpush.msra.mxu1 %v43_v3  ;;  %151 = vmatpush.msra.mxu3 %v126_v12  ;;  %v34_v19 = vld [vmem:[%s419_s0] sm:$0x3]  ;;  %v48_v21 = vld [vmem:[%s420_s1 + $0x68] sm:$0xff]  ;;  %v123_v23 = vld [vmem:[#allocation2 + $0xd0] sm:$0xff] }
   0xe   :  { %132 = vmatpush.msra.mxu2 %v109_v11  ;;  %v106_v22 = vld [vmem:[#allocation2 + $0x48] sm:$0xff]  ;;  %v46_v24 = vld [vmem:[%s420_s1 + $0x58] sm:$0xff]  ;;  %v105_v25 = vld [vmem:[#allocation2 + $0x40] sm:$0xff] }
   0xf   :  { %67 = vmatpush.msra.mxu1 %v41_v5  ;;  %152 = vmatpush.msra.mxu3 %v125_v15  ;;  %v122_v26 = vld [vmem:[#allocation2 + $0xc8] sm:$0xff]  ;;  %v104_v28 = vld [vmem:[#allocation2 + $0x38] sm:$0xff]  ;;  %v121_v29 = vld [vmem:[#allocation2 + $0xc0] sm:$0xff] }
  0x10   :  { %133 = vmatpush.msra.mxu2 %v108_v14  ;;  %v44_v27 = vld [vmem:[%s420_s1 + $0x48] sm:$0xff]  ;;  %v42_v30 = vld [vmem:[%s420_s1 + $0x38] sm:$0xff]  ;;  %v103_v31 = vld [vmem:[#allocation2 + $0x30] sm:$0xff] }
  0x11   :  { %68 = vmatpush.msra.mxu1 %v39_v9  ;;  %153 = vmatpush.msra.mxu3 %v124_v20  ;;  %v120_v32 = vld [vmem:[#allocation2 + $0xb8] sm:$0xff]  ;;  %v40_v33 = vld [vmem:[%s420_s1 + $0x28] sm:$0xff]  ;;  %v119_v35 = vld [vmem:[#allocation2 + $0xb0] sm:$0xff] }
  0x12   :  { %134 = vmatpush.msra.mxu2 %v107_v18  ;;  %v102_v34 = vld [vmem:[#allocation2 + $0x28] sm:$0xff]  ;;  %v38_v36 = vld [vmem:[%s420_s1 + $0x18] sm:$0xff]  ;;  %v101_v37 = vld [vmem:[#allocation2 + $0x20] sm:$0xff] }
  0x13   :  { %69 = vmatpush.msra.mxu1 %v37_v13  ;;  %154 = vmatpush.msra.mxu3 %v123_v23  ;;  %v36_v38 = vld [vmem:[%s420_s1 + $0x8] sm:$0xff]  ;;  %v100_v39 = vld [vmem:[#allocation2 + $0x18] sm:$0xff]  ;;  %v99_v40 = vld [vmem:[#allocation2 + $0x10] sm:$0xff] }
  0x14   :  { %135 = vmatpush.msra.mxu2 %v106_v22  ;;  %v98_v41 = vld [vmem:[#allocation2 + $0x8] sm:$0xff]  ;;  %v97_v43 = vld [vmem:[#allocation2] sm:$0xff]  ;;  %v116_v45 = vld [vmem:[#allocation2 + $0x98] sm:$0xff] }
  0x15   :  { %70 = vmatpush.msra.mxu1 %v35_v16  ;;  %155 = vmatpush.msra.mxu3 %v122_v26  ;;  %v118_v42 = vld [vmem:[#allocation2 + $0xa8] sm:$0xff]  ;;  %v117_v44 = vld [vmem:[#allocation2 + $0xa0] sm:$0xff]  ;;  %v115_v46 = vld [vmem:[#allocation2 + $0x90] sm:$0xff] }
  0x16   :  { %225 = vmatmul.msk.f32.vlgmr.msra.gmra.mxu1 %vm51_vm0, %v34_v19  ;;  %136 = vmatpush.msra.mxu2 %v105_v25  ;;  %v114_v47 = vld [vmem:[#allocation2 + $0x88] sm:$0xff]  ;;  %v113_v48 = vld [vmem:[#allocation2 + $0x80] sm:$0xff]  ;;  %v185_v49 = vld [vmem:[%s422_s3 + $0x78] sm:$0xff] }
  0x17   :  { %83 = vmatpush.msrb.mxu1 %v50_v17  ;;  %156 = vmatpush.msra.mxu3 %v121_v29  ;;  %v184_v50 = vld [vmem:[%s422_s3 + $0x70] sm:$0xff]  ;;  %v183_v51 = vld [vmem:[%s422_s3 + $0x68] sm:$0xff]  ;;  %v182_v52 = vld [vmem:[%s422_s3 + $0x60] sm:$0xff] }
  0x18   :  { %137 = vmatpush.msra.mxu2 %v104_v28  ;;  %186 = vmatpush.msra.mxu0 %v185_v49  ;;  %v181_v53 = vld [vmem:[%s422_s3 + $0x58] sm:$0xff]  ;;  %v180_v54 = vld [vmem:[%s422_s3 + $0x50] sm:$0xff]  ;;  %v179_v55 = vld [vmem:[%s422_s3 + $0x48] sm:$0xff] }
  0x19   :  { %84 = vmatpush.msrb.mxu1 %v48_v21  ;;  %157 = vmatpush.msra.mxu3 %v120_v32  ;;  %v178_v56 = vld [vmem:[%s422_s3 + $0x40] sm:$0xff]  ;;  %v177_v57 = vld [vmem:[%s422_s3 + $0x38] sm:$0xff]  ;;  %v176_v62 = vld [vmem:[%s422_s3 + $0x30] sm:$0xff] }
  0x1a   :  { %138 = vmatpush.msra.mxu2 %v103_v31  ;;  %187 = vmatpush.msra.mxu0 %v184_v50  ;;  %v175_v63 = vld [vmem:[%s422_s3 + $0x28] sm:$0xff]  ;;  %v174_v0 = vld [vmem:[%s422_s3 + $0x20] sm:$0xff]  ;;  %v173_v1 = vld [vmem:[%s422_s3 + $0x18] sm:$0xff] }
  0x1b   :  { %85 = vmatpush.msrb.mxu1 %v46_v24  ;;  %158 = vmatpush.msra.mxu3 %v119_v35  ;;  %v172_v2 = vld [vmem:[%s422_s3 + $0x10] sm:$0xff]  ;;  %v171_v3 = vld [vmem:[%s422_s3 + $0x8] sm:$0xff]  ;;  %v170_v4 = vld [vmem:[%s422_s3] sm:$0xff] }
  0x1c   :  { %139 = vmatpush.msra.mxu2 %v102_v34  ;;  %188 = vmatpush.msra.mxu0 %v183_v51 }
  0x1d   :  { %86 = vmatpush.msrb.mxu1 %v44_v27  ;;  %159 = vmatpush.msra.mxu3 %v118_v42 }
  0x1e   :  { %140 = vmatpush.msra.mxu2 %v101_v37  ;;  %189 = vmatpush.msra.mxu0 %v182_v52 }
  0x1f   :  { %87 = vmatpush.msrb.mxu1 %v42_v30  ;;  %160 = vmatpush.msra.mxu3 %v117_v44 }
  0x20   :  { %141 = vmatpush.msra.mxu2 %v100_v39  ;;  %190 = vmatpush.msra.mxu0 %v181_v53 }
  0x21   :  { %88 = vmatpush.msrb.mxu1 %v40_v33  ;;  %161 = vmatpush.msra.mxu3 %v116_v45 }
  0x22   :  { %142 = vmatpush.msra.mxu2 %v99_v40  ;;  %191 = vmatpush.msra.mxu0 %v180_v54 }
  0x23   :  { %89 = vmatpush.msrb.mxu1 %v38_v36  ;;  %162 = vmatpush.msra.mxu3 %v115_v46 }
  0x24   :  { %143 = vmatpush.msra.mxu2 %v98_v41  ;;  %192 = vmatpush.msra.mxu0 %v179_v55 }
  0x25   :  { %90 = vmatpush.msrb.mxu1 %v36_v38  ;;  %163 = vmatpush.msra.mxu3 %v114_v47 }
  0x26   :  { %226 = vmatmul.msk.f32.vlgmr.msrb.gmra.mxu1 %vm51_vm0, %v34_v19  ;;  %144 = vmatpush.msra.mxu2 %v97_v43 }
  0x27   :  { %164 = vmatpush.msra.mxu3 %v113_v48  ;;  %193 = vmatpush.msra.mxu0 %v178_v56 }
  0x29   :  { %194 = vmatpush.msra.mxu0 %v177_v57 }
  0x2b   :  { %195 = vmatpush.msra.mxu0 %v176_v62 }
  0x2d   :  { %196 = vmatpush.msra.mxu0 %v175_v63 }
  0x2f   :  { %197 = vmatpush.msra.mxu0 %v174_v0 }
  0x31   :  { %198 = vmatpush.msra.mxu0 %v173_v1 }
  0x33   :  { %199 = vmatpush.msra.mxu0 %v172_v2 }
  0x35   :  { %200 = vmatpush.msra.mxu0 %v171_v3 }
  0x37   :  { %201 = vmatpush.msra.mxu0 %v170_v4 }
  0x93   :  { %v72_v58 = vpop.f32.mrf.mxu1 }
  0x94   :  { %v95_v59 = vmax.f32 %v72_v58, 0.0 }
  0x96   :  { %145 = vmatmul.f32.vlgmr.msra.gmra.mxu2 %v95_v59 }
  0xa3   :  { %v92_v60 = vpop.f32.mrf.mxu1 }
  0xa4   :  { %v96_v61 = vmax.f32 %v92_v60, 0.0 }
  0xa6   :  { %165 = vmatmul.f32.vlgmr.msra.gmra.mxu3 %v96_v61 }
 0x119   :  { %v146_v5 = vpop.f32.mrf.mxu2 }
 0x129   :  { %v166_v6 = vpop.f32.mrf.mxu3 }
 0x12a   :  { %v167_v7 = vadd.f32 %v166_v6, %v146_v5 }
 0x12c   :  { %v169_v8 = vmax.f32 %v167_v7, 0.0 }
 0x12e   :  { %202 = vmatmul.f32.vlgmr.msra.gmra.mxu0 %v169_v8 }
 0x1ab   :  { %v203_v9 = vpop.f32.mrf.mxu0 }
 0x1ac   :  { %207 = vst.msk [vmem:[#allocation5] sm:$0x3] %vm206_vm1, %v203_v9 }
 0x1ad   :  { %218 = dma.vmem_to_hbm [thread:$0]  %s214_s30, 32, %s216_s7, [#allocation4]  }
 0x1ae   :  { %281 = dma.done.wait [#allocation4], 32  }
 0x1af   :  { %282 = vsyncadd [#allocation4], 4294967264 }
 0x1b0   :  { %223 = vsyncpa [#allocation3], 1 }
 0x1b1   :  { %224 = vsyncpa [#allocation4], 1 }

</bundles_post_ra>
